<compile_context>
chip_gen: v6e
topology: v6e:2x2x1
jax: 0.10.0
libtpu: 0.0.40
codegen_flags: <defaults>
</compile_context>

<pallas_src>
from collections import OrderedDict

import jax
import jax.numpy as jnp
from jax import lax
from jax.experimental import pallas as pl
from jax.experimental.pallas import tpu as pltpu


def _round_up(x: int, m: int) -> int:
    return ((x + m - 1) // m) * m


# ----------------------------- Pallas kernel -------------------------------


def _group_embedding_kernel(t2f_ref, shift_ref, ids_ref, table_ref,
                            out_ref, acc_ref):
    """Fused SUM-pooled embedding bags for one feature group.

    Grid: (nB batch tiles ["parallel"], nV vocab tiles ["arbitrary"]).

    t2f_ref:   [nV]       int32 SMEM  vocab tile -> owning feature (only used
                                      by the ids index_map)
    shift_ref: [nV]       int32 SMEM  feature-local row offset of the tile
    ids_ref:   [1, Bt, L] int32 VMEM  owning feature's bag ids (-1 = padding)
    table_ref: [tV, Dp]   bf16  VMEM  current vocab tile of the packed table
    out_ref:   [Bt, Dp]   bf16        group output tile (written at last v)
    acc_ref:   [Bt, Dp]   f32   VMEM  scratch accumulator across vocab tiles
    """
    del t2f_ref  # consumed only by the index_maps
    v = pl.program_id(1)
    n_v = pl.num_programs(1)

    @pl.when(v == 0)
    def _():
        acc_ref[...] = jnp.zeros_like(acc_ref)

    ids = ids_ref[0]                                   # [Bt, L] int32
    bt, bag_len = ids.shape
    t_v = table_ref.shape[0]

    # Feature-local ids relative to the current vocab tile.  Padded slots are
    # id = -1 and out-of-range ids never match the [0, tV) lane iota below
    # (silently dropped, matching the upstream "ids are in range" guarantee).
    local = ids - shift_ref[v]                         # [Bt, L] int32
    lane = lax.broadcasted_iota(jnp.int32, (1, t_v), 1)

    # counts[b, vv] = #{l : local[b, l] == vv}.  Built per 8-row sublane strip
    # so each [8, tV] strip stays vreg-resident across the whole L loop; no
    # [B, L, V] one-hot is ever materialized.  f32 accumulate, single bf16
    # cast before the MXU (exact since counts <= L <= 256).
    strips = []
    for s0 in range(0, bt, 8):
        loc_s = local[s0:s0 + 8, :]                    # [8, L]
        c = jnp.zeros((8, t_v), jnp.float32)
        if bag_len <= 16:
            for l in range(bag_len):                   # short bags: unrolled
                c = c + (loc_s[:, l:l + 1] == lane).astype(jnp.float32)
        else:
            def body(l, c):
                col = lax.dynamic_slice(loc_s, (0, l), (8, 1))
                return c + (col == lane).astype(jnp.float32)
            c = lax.fori_loop(0, bag_len, body, c, unroll=8)
        strips.append(c)
    counts = jnp.concatenate(strips, axis=0)           # [Bt, tV]

    # SUM pooling == counts @ table on the MXU; bf16 operands, f32 accumulate.
    acc_ref[...] += jnp.dot(counts.astype(jnp.bfloat16), table_ref[...],
                            preferred_element_type=jnp.float32)

    @pl.when(v == n_v - 1)
    def _():
        out_ref[...] = acc_ref[...].astype(out_ref.dtype)


def fused_group_embedding(ids, table, tile2feat, tile_shift, *,
                          vocab_tile, batch_tile, out_dtype=jnp.bfloat16):
    """ids: [F, Bp, L] int32 (pad = -1); table: [K, Dp] bf16 block-diagonal.

    Returns the group's pooled-and-concatenated embeddings [Bp, Dp]."""
    num_feat, b_pad, bag_len = ids.shape
    k_total, d_pad = table.shape
    assert k_total % vocab_tile == 0 and b_pad % batch_tile == 0
    assert d_pad % 128 == 0 and batch_tile % 16 == 0
    n_v = k_total // vocab_tile
    n_b = b_pad // batch_tile

    # Derive the scoped-VMEM request from the actual tiles (double-buffered
    # ids/table/out + resident f32 accumulator + headroom).  Cap at 48 MiB:
    # never request the whole 64 MiB physical VMEM of a v7x TensorCore.
    blk_ids = batch_tile * max(bag_len, 128) * 4
    blk_tbl = vocab_tile * d_pad * 2
    blk_out = batch_tile * d_pad * 2
    blk_acc = batch_tile * d_pad * 4
    vmem_est = 2 * (blk_ids + blk_tbl + blk_out) + blk_acc + (4 << 20)
    vmem_limit = int(min(max(vmem_est, 16 << 20), 48 << 20))

    return pl.pallas_call(
        _group_embedding_kernel,
        grid_spec=pltpu.PrefetchScalarGridSpec(
            num_scalar_prefetch=2,
            grid=(n_b, n_v),
            in_specs=[
                # Only the feature that owns vocab tile v gets its ids DMA'd.
                pl.BlockSpec((1, batch_tile, bag_len),
                             lambda b, v, t2f, sh: (t2f[v], b, 0)),
                pl.BlockSpec((vocab_tile, d_pad),
                             lambda b, v, t2f, sh: (v, 0)),
            ],
            out_specs=pl.BlockSpec((batch_tile, d_pad),
                                   lambda b, v, t2f, sh: (b, 0)),
            scratch_shapes=[pltpu.VMEM((batch_tile, d_pad), jnp.float32)],
        ),
        out_shape=jax.ShapeDtypeStruct((b_pad, d_pad), out_dtype),
        compiler_params=pltpu.CompilerParams(
            dimension_semantics=("parallel", "arbitrary"),
            vmem_limit_bytes=vmem_limit,
        ),
    )(tile2feat, tile_shift, ids, table)


# --------------------- EmbeddingGroupImpl (JAX version) --------------------


class EmbeddingGroupImplPallas:
    """JAX/Pallas analogue of tzrec EmbeddingGroupImpl (ebc + dense + regroup).

    features: list of dicts with keys:
        name, is_sparse, num_embeddings, embedding_dim (sparse) / output_dim (dense)
    feature_groups: list of dicts with keys: group_name, feature_names, group_type
        group_type in {"DEEP", "WIDE"}.
    """

    def __init__(self, features, feature_groups, wide_embedding_dim=4, seed=0,
                 vocab_tile=512, batch_tile=256, out_dtype=jnp.bfloat16):
        self._name_to_feature = {f["name"]: f for f in features}
        self._feature_groups = feature_groups
        self._wide_dim = wide_embedding_dim
        self._batch_tile = batch_tile
        self._out_dtype = out_dtype

        self._group_to_feature_names = OrderedDict()
        self._group_total_dim = OrderedDict()
        self._group_feature_output_dims = OrderedDict()
        self._group_plan = OrderedDict()

        # embedding tables, shared by emb_name (deep vs "<emb>_wide"), bf16.
        self.tables = OrderedDict()
        key = jax.random.PRNGKey(seed)

        for fg in feature_groups:
            group_name = fg["group_name"]
            is_wide = fg["group_type"] == "WIDE"
            total_dim = 0
            output_dims = OrderedDict()
            sparse_entries = []  # (feature_name, emb_name, vocab, out_dim)

            for name in fg["feature_names"]:
                feat = self._name_to_feature[name]
                if feat["is_sparse"]:
                    emb_name = name + "_emb" + ("_wide" if is_wide else "")
                    out_dim = self._wide_dim if is_wide else feat["embedding_dim"]
                    if emb_name not in self.tables:
                        key, sub = jax.random.split(key)
                        # bf16 tables; f32 accumulation happens in the kernel.
                        self.tables[emb_name] = (
                            jax.random.normal(
                                sub, (feat["num_embeddings"], out_dim),
                                jnp.float32) * 0.05
                        ).astype(jnp.bfloat16)
                    sparse_entries.append(
                        (name, emb_name, feat["num_embeddings"], out_dim))
                else:
                    if is_wide:
                        raise ValueError(
                            f"dense feature [{name}] should not be in wide group.")
                    out_dim = feat["output_dim"]
                total_dim += out_dim
                output_dims[name] = out_dim

            self._group_to_feature_names[group_name] = list(fg["feature_names"])
            self._group_total_dim[group_name] = total_dim
            self._group_feature_output_dims[group_name] = output_dims
            self._group_plan[group_name] = self._build_group_plan(
                sparse_entries, vocab_tile)

    # -- planning -----------------------------------------------------------

    def _build_group_plan(self, sparse_entries, vocab_tile):
        if not sparse_entries:
            return dict(sparse_entries=[], table=None)

        max_v = max(e[2] for e in sparse_entries)
        # 128-aligned vocab tile: full MXU K passes + bf16 (16,128) tiling.
        t_v = max(128, min(_round_up(vocab_tile, 128), _round_up(max_v, 128)))

        voffs, doffs = [], []
        tile2feat, tile_shift = [], []
        voff = doff = 0
        for f_idx, (_, _, vocab, d) in enumerate(sparse_entries):
            voffs.append(voff)
            doffs.append(doff)
            n_tiles = _round_up(vocab, t_v) // t_v
            for t in range(n_tiles):
                tile2feat.append(f_idx)
                tile_shift.append(t * t_v)   # feature-local row offset of tile
            voff += n_tiles * t_v
            doff += d
        k_total, d_total = voff, doff
        d_pad = _round_up(d_total, 128)

        # Block-diagonal packed table: feature f owns rows [voff_f, voff_f+V_f)
        # and cols [doff_f, doff_f+d_f); everything else (incl. the <=127
        # lane-pad columns at the end) is zero.
        table = jnp.zeros((k_total, d_pad), jnp.bfloat16)
        for (_, emb_name, vocab, d), vo, do in zip(sparse_entries, voffs, doffs):
            table = table.at[vo:vo + vocab, do:do + d].set(self.tables[emb_name])

        return dict(
            sparse_entries=sparse_entries, vocab_tile=t_v,
            d_total=d_total, d_pad=d_pad, doffs=doffs, table=table,
            tile2feat=jnp.asarray(tile2feat, jnp.int32),
            tile_shift=jnp.asarray(tile_shift, jnp.int32))

    # -- public API ----------------------------------------------------------

    def group_dims(self, group_name):
        return list(self._group_feature_output_dims[group_name].values())

    def group_feature_dims(self, group_name):
        return self._group_feature_output_dims[group_name]

    def group_total_dim(self, group_name):
        return self._group_total_dim[group_name]

    def forward(self, sparse_feature, dense_feature):
        """sparse_feature: dict name -> (ids [B,L] i32, mask [B,L] {0,1} f32)
        dense_feature:  dict name -> [B, D] f32
        returns dict group_name -> [B, group_total_dim] f32
        """
        group_out = OrderedDict()
        for fg in self._feature_groups:
            group_name = fg["group_name"]
            plan = self._group_plan[group_name]
            sparse_entries = plan["sparse_entries"]

            pooled = None
            batch = None
            if sparse_entries:
                # Fold the 0/1 validity mask into the ids (pad slot -> id=-1):
                # removes a whole [F,B,L] f32 DMA and a VPU select per slot.
                # TODO(synk): per-sample weighted bags are not supported here.
                ids_list = []
                for (name, _, _, _) in sparse_entries:
                    ids, mask = sparse_feature[name]
                    ids_list.append(
                        jnp.where(mask > 0.5, ids.astype(jnp.int32), -1))
                ids_stack = jnp.stack(ids_list)                  # [F, B, L]
                batch = ids_stack.shape[1]
                bt = _round_up(min(self._batch_tile, batch), 16)
                b_pad = _round_up(batch, bt)
                if b_pad != batch:
                    ids_stack = jnp.pad(
                        ids_stack, ((0, 0), (0, b_pad - batch), (0, 0)),
                        constant_values=-1)
                pooled = fused_group_embedding(
                    ids_stack, plan["table"],
                    plan["tile2feat"], plan["tile_shift"],
                    vocab_tile=plan["vocab_tile"], batch_tile=bt,
                    out_dtype=self._out_dtype)

            pieces = []
            sparse_idx = 0
            for name in fg["feature_names"]:
                feat = self._name_to_feature[name]
                if feat["is_sparse"]:
                    d = sparse_entries[sparse_idx][3]
                    do = plan["doffs"][sparse_idx]
                    pieces.append(pooled[:batch, do:do + d])
                    sparse_idx += 1
                else:
                    pieces.append(dense_feature[name])
            group_out[group_name] = jnp.concatenate(
                pieces, axis=-1).astype(jnp.float32)
        return group_out


# ------------------------------ reference ----------------------------------


def _ref_embedding_bag_sum(ids, mask, table_bf16):
    emb = jnp.take(table_bf16.astype(jnp.float32), ids, axis=0)   # [B, L, D]
    return jnp.sum(emb * mask[:, :, None], axis=1)                # [B, D]


# -------------------------------- main --------------------------------------


if __name__ == "__main__":
    # Small demo shapes.  batch_tile=16 with B=32 exercises the "parallel"
    # batch-tile axis; two 128-row vocab tiles exercise the reduction axis
    # (f32 scratch accumulate + bf16 write on the last tile) and the
    # scalar-prefetched tile->feature selection.
    B, L = 32, 8

    features = [
        dict(name="cat_a", is_sparse=True, num_embeddings=32, embedding_dim=16),
        dict(name="cat_b", is_sparse=True, num_embeddings=48, embedding_dim=8),
        dict(name="dense_c", is_sparse=False, output_dim=4),
    ]
    feature_groups = [
        dict(group_name="deep", feature_names=["cat_a", "cat_b", "dense_c"],
             group_type="DEEP"),
        dict(group_name="wide", feature_names=["cat_a", "cat_b"],
             group_type="WIDE"),
    ]

    module = EmbeddingGroupImplPallas(features, feature_groups,
                                      wide_embedding_dim=4, seed=0,
                                      vocab_tile=512, batch_tile=16)

    key = jax.random.PRNGKey(0)
    sparse_feature = {}
    for f in features:
        if not f["is_sparse"]:
            continue
        key, k_ids, k_len = jax.random.split(key, 3)
        ids = jax.random.randint(k_ids, (B, L), 0, f["num_embeddings"], jnp.int32)
        lengths = jax.random.randint(k_len, (B,), 0, L + 1, jnp.int32)
        mask = (jnp.arange(L)[None, :] < lengths[:, None]).astype(jnp.float32)
        sparse_feature[f["name"]] = (ids, mask)

    key, k_dense = jax.random.split(key)
    dense_feature = {"dense_c": jax.random.normal(k_dense, (B, 4), jnp.float32)}

    out = module.forward(sparse_feature, dense_feature)
    out = jax.tree_util.tree_map(jax.block_until_ready, out)

    # sanity vs pure-JAX reference (same bf16 tables; kernel output slab is
    # bf16, hence the loose tolerance)
    for fg in feature_groups:
        gname = fg["group_name"]
        is_wide = fg["group_type"] == "WIDE"
        pieces = []
        for name in fg["feature_names"]:
            feat = module._name_to_feature[name]
            if feat["is_sparse"]:
                emb_name = name + "_emb" + ("_wide" if is_wide else "")
                ids, mask = sparse_feature[name]
                pieces.append(
                    _ref_embedding_bag_sum(ids, mask, module.tables[emb_name]))
            else:
                pieces.append(dense_feature[name])
        ref = jnp.concatenate(pieces, axis=-1)
        assert out[gname].shape == (B, module.group_total_dim(gname)), out[gname].shape
        err = jnp.max(jnp.abs(out[gname] - ref))
        assert jnp.allclose(out[gname], ref, atol=1e-2, rtol=1e-2), \
            f"mismatch in group {gname}: max abs err {err}"

    print("KERNEL_OK")
</pallas_src>

<mosaic_0001>
module attributes {stable_mosaic.version = 11 : i64} {
  func.func @_group_embedding_kernel(%arg0: i32, %arg1: i32, %arg2: memref<2xi32, #tpu.memory_space<smem>>, %arg3: memref<2xi32, #tpu.memory_space<smem>>, %arg4: memref<1x16x8xi32, #tpu.memory_space<vmem>>, %arg5: memref<128x128xbf16, #tpu.memory_space<vmem>>, %arg6: memref<16x128xbf16, #tpu.memory_space<vmem>>, %arg7: memref<16x128xf32, #tpu.memory_space<vmem>>) attributes {dimension_semantics = [#tpu.dimension_semantics<parallel>, #tpu.dimension_semantics<arbitrary>], iteration_bounds = array<i64: 2, 2>, scalar_prefetch = 2 : i64, scratch_operands = 1 : i64, tpu.core_type = #tpu.core_type<tc>, window_params = [{transform_indices = @transform_0, window_bounds = array<i64: 1, 16, 8>}, {transform_indices = @transform_1, window_bounds = array<i64: 128, 128>}, {transform_indices = @transform_2, window_bounds = array<i64: 16, 128>}]} {
    %c0_i32 = arith.constant 0 : i32
    %0 = arith.cmpi eq, %arg1, %c0_i32 : i32
    %1 = arith.extui %0 : i1 to i32
    %c0_i32_0 = arith.constant 0 : i32
    %2 = arith.cmpi ne, %1, %c0_i32_0 : i32
    scf.if %2 {
      %cst_12 = arith.constant 0.000000e+00 : f32
      %136 = vector.broadcast %cst_12 : f32 to vector<16x128xf32>
      %c0_13 = arith.constant 0 : index
      %c0_14 = arith.constant 0 : index
      %137 = vector.load %arg7[%c0_13, %c0_14] : memref<16x128xf32, #tpu.memory_space<vmem>>, vector<16x128xf32>
      tpu.vector_store %arg7[%c0_13, %c0_14], %136 {strides = array<i32>} : memref<16x128xf32, #tpu.memory_space<vmem>>, vector<16x128xf32>,
    } else {
    }
    %c0 = arith.constant 0 : index
    %c0_1 = arith.constant 0 : index
    %c0_2 = arith.constant 0 : index
    %3 = vector.load %arg4[%c0, %c0_1, %c0_2] : memref<1x16x8xi32, #tpu.memory_space<vmem>>, vector<1x16x8xi32>
    %4 = vector.shape_cast %3 : vector<1x16x8xi32> to vector<16x8xi32>
    %5 = arith.index_cast %arg1 : i32 to index
    %6 = memref.load %arg3[%5] : memref<2xi32, #tpu.memory_space<smem>>
    %7 = vector.broadcast %6 : i32 to vector<16x8xi32>
    %8 = arith.subi %4, %7 : vector<16x8xi32>
    %9 = tpu.iota {dimensions = array<i32: 1>} : vector<1x128xi32>
    %10 = vector.extract_strided_slice %8 {offsets = [0, 0], sizes = [8, 8], strides = [1, 1]} : vector<16x8xi32> to vector<8x8xi32>
    %cst = arith.constant 0.000000e+00 : f32
    %11 = vector.broadcast %cst : f32 to vector<8x128xf32>
    %12 = vector.extract_strided_slice %10 {offsets = [0, 0], sizes = [8, 1], strides = [1, 1]} : vector<8x8xi32> to vector<8x1xi32>
    %13 = vector.broadcast %12 : vector<8x1xi32> to vector<8x128xi32>
    %14 = vector.broadcast %9 : vector<1x128xi32> to vector<8x128xi32>
    %15 = arith.cmpi eq, %13, %14 : vector<8x128xi32>
    %16 = arith.extui %15 : vector<8x128xi1> to vector<8x128xi32>
    %17 = arith.sitofp %16 : vector<8x128xi32> to vector<8x128xf32>
    %18 = arith.addf %11, %17 : vector<8x128xf32>
    %19 = vector.extract_strided_slice %10 {offsets = [0, 1], sizes = [8, 1], strides = [1, 1]} : vector<8x8xi32> to vector<8x1xi32>
    %20 = vector.broadcast %19 : vector<8x1xi32> to vector<8x128xi32>
    %21 = vector.broadcast %9 : vector<1x128xi32> to vector<8x128xi32>
    %22 = arith.cmpi eq, %20, %21 : vector<8x128xi32>
    %23 = arith.extui %22 : vector<8x128xi1> to vector<8x128xi32>
    %24 = arith.sitofp %23 : vector<8x128xi32> to vector<8x128xf32>
    %25 = arith.addf %18, %24 : vector<8x128xf32>
    %26 = vector.extract_strided_slice %10 {offsets = [0, 2], sizes = [8, 1], strides = [1, 1]} : vector<8x8xi32> to vector<8x1xi32>
    %27 = vector.broadcast %26 : vector<8x1xi32> to vector<8x128xi32>
    %28 = vector.broadcast %9 : vector<1x128xi32> to vector<8x128xi32>
    %29 = arith.cmpi eq, %27, %28 : vector<8x128xi32>
    %30 = arith.extui %29 : vector<8x128xi1> to vector<8x128xi32>
    %31 = arith.sitofp %30 : vector<8x128xi32> to vector<8x128xf32>
    %32 = arith.addf %25, %31 : vector<8x128xf32>
    %33 = vector.extract_strided_slice %10 {offsets = [0, 3], sizes = [8, 1], strides = [1, 1]} : vector<8x8xi32> to vector<8x1xi32>
    %34 = vector.broadcast %33 : vector<8x1xi32> to vector<8x128xi32>
    %35 = vector.broadcast %9 : vector<1x128xi32> to vector<8x128xi32>
    %36 = arith.cmpi eq, %34, %35 : vector<8x128xi32>
    %37 = arith.extui %36 : vector<8x128xi1> to vector<8x128xi32>
    %38 = arith.sitofp %37 : vector<8x128xi32> to vector<8x128xf32>
    %39 = arith.addf %32, %38 : vector<8x128xf32>
    %40 = vector.extract_strided_slice %10 {offsets = [0, 4], sizes = [8, 1], strides = [1, 1]} : vector<8x8xi32> to vector<8x1xi32>
    %41 = vector.broadcast %40 : vector<8x1xi32> to vector<8x128xi32>
    %42 = vector.broadcast %9 : vector<1x128xi32> to vector<8x128xi32>
    %43 = arith.cmpi eq, %41, %42 : vector<8x128xi32>
    %44 = arith.extui %43 : vector<8x128xi1> to vector<8x128xi32>
    %45 = arith.sitofp %44 : vector<8x128xi32> to vector<8x128xf32>
    %46 = arith.addf %39, %45 : vector<8x128xf32>
    %47 = vector.extract_strided_slice %10 {offsets = [0, 5], sizes = [8, 1], strides = [1, 1]} : vector<8x8xi32> to vector<8x1xi32>
    %48 = vector.broadcast %47 : vector<8x1xi32> to vector<8x128xi32>
    %49 = vector.broadcast %9 : vector<1x128xi32> to vector<8x128xi32>
    %50 = arith.cmpi eq, %48, %49 : vector<8x128xi32>
    %51 = arith.extui %50 : vector<8x128xi1> to vector<8x128xi32>
    %52 = arith.sitofp %51 : vector<8x128xi32> to vector<8x128xf32>
    %53 = arith.addf %46, %52 : vector<8x128xf32>
    %54 = vector.extract_strided_slice %10 {offsets = [0, 6], sizes = [8, 1], strides = [1, 1]} : vector<8x8xi32> to vector<8x1xi32>
    %55 = vector.broadcast %54 : vector<8x1xi32> to vector<8x128xi32>
    %56 = vector.broadcast %9 : vector<1x128xi32> to vector<8x128xi32>
    %57 = arith.cmpi eq, %55, %56 : vector<8x128xi32>
    %58 = arith.extui %57 : vector<8x128xi1> to vector<8x128xi32>
    %59 = arith.sitofp %58 : vector<8x128xi32> to vector<8x128xf32>
    %60 = arith.addf %53, %59 : vector<8x128xf32>
    %61 = vector.extract_strided_slice %10 {offsets = [0, 7], sizes = [8, 1], strides = [1, 1]} : vector<8x8xi32> to vector<8x1xi32>
    %62 = vector.broadcast %61 : vector<8x1xi32> to vector<8x128xi32>
    %63 = vector.broadcast %9 : vector<1x128xi32> to vector<8x128xi32>
    %64 = arith.cmpi eq, %62, %63 : vector<8x128xi32>
    %65 = arith.extui %64 : vector<8x128xi1> to vector<8x128xi32>
    %66 = arith.sitofp %65 : vector<8x128xi32> to vector<8x128xf32>
    %67 = arith.addf %60, %66 : vector<8x128xf32>
    %68 = vector.extract_strided_slice %8 {offsets = [8, 0], sizes = [8, 8], strides = [1, 1]} : vector<16x8xi32> to vector<8x8xi32>
    %cst_3 = arith.constant 0.000000e+00 : f32
    %69 = vector.broadcast %cst_3 : f32 to vector<8x128xf32>
    %70 = vector.extract_strided_slice %68 {offsets = [0, 0], sizes = [8, 1], strides = [1, 1]} : vector<8x8xi32> to vector<8x1xi32>
    %71 = vector.broadcast %70 : vector<8x1xi32> to vector<8x128xi32>
    %72 = vector.broadcast %9 : vector<1x128xi32> to vector<8x128xi32>
    %73 = arith.cmpi eq, %71, %72 : vector<8x128xi32>
    %74 = arith.extui %73 : vector<8x128xi1> to vector<8x128xi32>
    %75 = arith.sitofp %74 : vector<8x128xi32> to vector<8x128xf32>
    %76 = arith.addf %69, %75 : vector<8x128xf32>
    %77 = vector.extract_strided_slice %68 {offsets = [0, 1], sizes = [8, 1], strides = [1, 1]} : vector<8x8xi32> to vector<8x1xi32>
    %78 = vector.broadcast %77 : vector<8x1xi32> to vector<8x128xi32>
    %79 = vector.broadcast %9 : vector<1x128xi32> to vector<8x128xi32>
    %80 = arith.cmpi eq, %78, %79 : vector<8x128xi32>
    %81 = arith.extui %80 : vector<8x128xi1> to vector<8x128xi32>
    %82 = arith.sitofp %81 : vector<8x128xi32> to vector<8x128xf32>
    %83 = arith.addf %76, %82 : vector<8x128xf32>
    %84 = vector.extract_strided_slice %68 {offsets = [0, 2], sizes = [8, 1], strides = [1, 1]} : vector<8x8xi32> to vector<8x1xi32>
    %85 = vector.broadcast %84 : vector<8x1xi32> to vector<8x128xi32>
    %86 = vector.broadcast %9 : vector<1x128xi32> to vector<8x128xi32>
    %87 = arith.cmpi eq, %85, %86 : vector<8x128xi32>
    %88 = arith.extui %87 : vector<8x128xi1> to vector<8x128xi32>
    %89 = arith.sitofp %88 : vector<8x128xi32> to vector<8x128xf32>
    %90 = arith.addf %83, %89 : vector<8x128xf32>
    %91 = vector.extract_strided_slice %68 {offsets = [0, 3], sizes = [8, 1], strides = [1, 1]} : vector<8x8xi32> to vector<8x1xi32>
    %92 = vector.broadcast %91 : vector<8x1xi32> to vector<8x128xi32>
    %93 = vector.broadcast %9 : vector<1x128xi32> to vector<8x128xi32>
    %94 = arith.cmpi eq, %92, %93 : vector<8x128xi32>
    %95 = arith.extui %94 : vector<8x128xi1> to vector<8x128xi32>
    %96 = arith.sitofp %95 : vector<8x128xi32> to vector<8x128xf32>
    %97 = arith.addf %90, %96 : vector<8x128xf32>
    %98 = vector.extract_strided_slice %68 {offsets = [0, 4], sizes = [8, 1], strides = [1, 1]} : vector<8x8xi32> to vector<8x1xi32>
    %99 = vector.broadcast %98 : vector<8x1xi32> to vector<8x128xi32>
    %100 = vector.broadcast %9 : vector<1x128xi32> to vector<8x128xi32>
    %101 = arith.cmpi eq, %99, %100 : vector<8x128xi32>
    %102 = arith.extui %101 : vector<8x128xi1> to vector<8x128xi32>
    %103 = arith.sitofp %102 : vector<8x128xi32> to vector<8x128xf32>
    %104 = arith.addf %97, %103 : vector<8x128xf32>
    %105 = vector.extract_strided_slice %68 {offsets = [0, 5], sizes = [8, 1], strides = [1, 1]} : vector<8x8xi32> to vector<8x1xi32>
    %106 = vector.broadcast %105 : vector<8x1xi32> to vector<8x128xi32>
    %107 = vector.broadcast %9 : vector<1x128xi32> to vector<8x128xi32>
    %108 = arith.cmpi eq, %106, %107 : vector<8x128xi32>
    %109 = arith.extui %108 : vector<8x128xi1> to vector<8x128xi32>
    %110 = arith.sitofp %109 : vector<8x128xi32> to vector<8x128xf32>
    %111 = arith.addf %104, %110 : vector<8x128xf32>
    %112 = vector.extract_strided_slice %68 {offsets = [0, 6], sizes = [8, 1], strides = [1, 1]} : vector<8x8xi32> to vector<8x1xi32>
    %113 = vector.broadcast %112 : vector<8x1xi32> to vector<8x128xi32>
    %114 = vector.broadcast %9 : vector<1x128xi32> to vector<8x128xi32>
    %115 = arith.cmpi eq, %113, %114 : vector<8x128xi32>
    %116 = arith.extui %115 : vector<8x128xi1> to vector<8x128xi32>
    %117 = arith.sitofp %116 : vector<8x128xi32> to vector<8x128xf32>
    %118 = arith.addf %111, %117 : vector<8x128xf32>
    %119 = vector.extract_strided_slice %68 {offsets = [0, 7], sizes = [8, 1], strides = [1, 1]} : vector<8x8xi32> to vector<8x1xi32>
    %120 = vector.broadcast %119 : vector<8x1xi32> to vector<8x128xi32>
    %121 = vector.broadcast %9 : vector<1x128xi32> to vector<8x128xi32>
    %122 = arith.cmpi eq, %120, %121 : vector<8x128xi32>
    %123 = arith.extui %122 : vector<8x128xi1> to vector<8x128xi32>
    %124 = arith.sitofp %123 : vector<8x128xi32> to vector<8x128xf32>
    %125 = arith.addf %118, %124 : vector<8x128xf32>
    %126 = tpu.concatenate %67, %125 in 0 : vector<8x128xf32>, vector<8x128xf32> -> vector<16x128xf32>
    %c0_4 = arith.constant 0 : index
    %c0_5 = arith.constant 0 : index
    %127 = vector.load %arg7[%c0_4, %c0_5] : memref<16x128xf32, #tpu.memory_space<vmem>>, vector<16x128xf32>
    %128 = arith.truncf %126 : vector<16x128xf32> to vector<16x128xbf16>
    %c0_6 = arith.constant 0 : index
    %c0_7 = arith.constant 0 : index
    %129 = vector.load %arg5[%c0_6, %c0_7] : memref<128x128xbf16, #tpu.memory_space<vmem>>, vector<128x128xbf16>
    %cst_8 = arith.constant dense<0.000000e+00> : vector<16x128xf32>
    %130 = tpu.matmul %128, %129, %cst_8 {dimension_numbers = #tpu.dot_dimension_numbers<[1], [0], [0], [1], [0, 0, 1, 1], [], []>} : vector<16x128xbf16>, vector<128x128xbf16>, vector<16x128xf32> -> vector<16x128xf32>
    %131 = arith.addf %127, %130 : vector<16x128xf32>
    %c0_9 = arith.constant 0 : index
    %c0_10 = arith.constant 0 : index
    %132 = vector.load %arg7[%c0_9, %c0_10] : memref<16x128xf32, #tpu.memory_space<vmem>>, vector<16x128xf32>
    tpu.vector_store %arg7[%c0_9, %c0_10], %131 {strides = array<i32>} : memref<16x128xf32, #tpu.memory_space<vmem>>, vector<16x128xf32>,
    %c1_i32 = arith.constant 1 : i32
    %133 = arith.cmpi eq, %arg1, %c1_i32 : i32
    %134 = arith.extui %133 : i1 to i32
    %c0_i32_11 = arith.constant 0 : i32
    %135 = arith.cmpi ne, %134, %c0_i32_11 : i32
    scf.if %135 {
      %c0_12 = arith.constant 0 : index
      %c0_13 = arith.constant 0 : index
      %136 = vector.load %arg7[%c0_12, %c0_13] : memref<16x128xf32, #tpu.memory_space<vmem>>, vector<16x128xf32>
      %137 = arith.truncf %136 : vector<16x128xf32> to vector<16x128xbf16>
      %c0_14 = arith.constant 0 : index
      %c0_15 = arith.constant 0 : index
      %138 = vector.load %arg6[%c0_14, %c0_15] : memref<16x128xbf16, #tpu.memory_space<vmem>>, vector<16x128xbf16>
      tpu.vector_store %arg6[%c0_14, %c0_15], %137 {strides = array<i32>} : memref<16x128xbf16, #tpu.memory_space<vmem>>, vector<16x128xbf16>,
    } else {
    }
    return
  }
  func.func @transform_0(%arg0: i32, %arg1: i32, %arg2: memref<2xi32, #tpu.memory_space<smem>>, %arg3: memref<2xi32, #tpu.memory_space<smem>>) -> (i32, i32, i32) {
    %0 = arith.index_cast %arg1 : i32 to index
    %1 = memref.load %arg2[%0] : memref<2xi32, #tpu.memory_space<smem>>
    %c0_i32 = arith.constant 0 : i32
    %c0_i32_0 = arith.constant 0 : i32
    return %1, %arg0, %c0_i32 : i32, i32, i32
  }
  func.func @transform_1(%arg0: i32, %arg1: i32, %arg2: memref<2xi32, #tpu.memory_space<smem>>, %arg3: memref<2xi32, #tpu.memory_space<smem>>) -> (i32, i32) {
    %c0_i32 = arith.constant 0 : i32
    %c0_i32_0 = arith.constant 0 : i32
    return %arg1, %c0_i32 : i32, i32
  }
  func.func @transform_2(%arg0: i32, %arg1: i32, %arg2: memref<2xi32, #tpu.memory_space<smem>>, %arg3: memref<2xi32, #tpu.memory_space<smem>>) -> (i32, i32) {
    %c0_i32 = arith.constant 0 : i32
    %c0_i32_0 = arith.constant 0 : i32
    return %arg0, %c0_i32 : i32, i32
  }
}

</mosaic_0001>

<bundles_post_ra>
// kernel: tpu_custom_call.1
= control target key start
LH: loop header
LB: loop body
LE: loop exit
PB: predicated region body
PF: predicated region fallthrough
CT: control target
= control target key end

     0   :  { %s1297_s0 = inlined_call_operand.vmem [shape: s32[2], index: 0, kind: input, shape index: {}]   ;;  %s1298_s2 = inlined_call_operand.vmem [shape: s32[2,32,8], index: 2, kind: input, shape index: {}]   ;;  %s1299_s3 = inlined_call_operand.hbm [shape: bf16[256,128], index: 3, kind: input, shape index: {}]   ;;  %s1300_s4 = inlined_call_operand.hbm [shape: bf16[32,128], index: 4, kind: output, shape index: {}]   ;;  %s1301_s1 = inlined_call_operand.vmem [shape: s32[2], index: 1, kind: input, shape index: {}]  }
   0x1   :  { %s9_s17 = sshll.u32 %s1297_s0, 4  ;;  %s13_s20 = sshll.u32 %s1301_s1, 4  ;;  %s10_s17 = int_to_ptr.vmem [resolvable:$true] %s9_s17  ;;  %s14_s20 = int_to_ptr.vmem [resolvable:$true] %s13_s20 }
   0x2   :  { %s827_s21 = scalar_lea.vmem %s10_s17, 16  ;;  %p832_p1 = scmp.lt.s32.totalorder %s10_s17, %s10_s17 }
   0x3   :  { %p828_p0 = scmp.ne.s32.totalorder %s10_s17, %s827_s21  ;;  %p833_p2 = scmp.lt.s32.totalorder %s827_s21, %s827_s21 }
   0x5   :  { %p834_p3 = por %p833_p2, %p832_p1 }
   0x7   :  { %p835_p4 = pnand %p834_p3, %p828_p0 }
   0x9   :  { %838 = shalt.err (!%p835_p4)  }
   0xa   :  { %s1003_s22 = smov [#allocation4]   ;;  %s839_s23 = scalar_lea.vmem %s14_s20, 16 }
   0xb   :  { %12 = dma.vmem_to_smem %s10_s17, 16, %s1003_s22, [#allocation3] }
   0xc   :  { %p840_p5 = scmp.ne.s32.totalorder %s14_s20, %s839_s23  ;;  %p844_p6 = scmp.lt.s32.totalorder %s14_s20, %s14_s20 }
   0xd   :  { %p845_p7 = scmp.lt.s32.totalorder %s839_s23, %s839_s23 }
   0xf   :  { %p846_p8 = por %p845_p7, %p844_p6 }
  0x11   :  { %p847_p9 = pnand %p846_p8, %p840_p5 }
  0x13   :  { %850 = shalt.err (!%p847_p9)  }
  0x14   :  { %s1004_s0 = smov [#allocation5]  }
  0x15   :  { %16 = dma.vmem_to_smem %s14_s20, 16, %s1004_s0, [#allocation3] }
  0x16   :  { %949 = dma.done.wait [#allocation3], 32 }
  0x17   :  { %950 = vsyncadd [#allocation3], 4294967264 }
  0x18   :  { %18 = sfence }
  0x19   :  { %19 = vsyncpa [#allocation7], 0 }
  0x1a   :  { %21 = vsyncpa [#allocation7 + $0x1], 0 }
  0x1b   :  { %22 = vsyncpa [#allocation8], 0 }
  0x1c   :  { %24 = vsyncpa [#allocation8 + $0x1], 0  ;;  %s1053_s1 = smov 0   ;;  %s1055_s24 = smov 0  }
  0x1d   :  { %s1057_s25 = smov 0   ;;  %s1059_s26 = smov 0  }
  0x1e   :  { %s1061_s27 = smov 0   ;;  %s1063_s28 = smov 0  }
  0x1f   :  { %s1065_s29 = smov 0   ;;  %s1067_s30 = smov 0  }
  0x20   :  { %s1069_s5 = smov 0   ;;  %s1071_s6 = smov 0  }
  0x21   :  { %s1073_s7 = smov 0  }
  0x22 LB: > { %1305 = sst [smem:[#allocation13_spill]] %s997_s6  ;;  %s602_s8 = sadd.s32 4294967295, %s1001_s7   ;;  %s1001_s7 = sphi %s1073_s7, %s30_s7   ;;  %s997_s6 = sphi %s1071_s6, %s1315_s6   ;;  %s993_s5 = sphi %s1069_s5, %s1323_s5   ;;  %s989_s30 = sphi %s1067_s30, %s1313_s30   ;;  %s985_s29 = sphi %s1065_s29, %s1322_s29   ;;  %s981_s28 = sphi %s1063_s28, %s1321_s28   ;;  %s977_s27 = sphi %s1061_s27, %s1320_s27   ;;  %s973_s26 = sphi %s1059_s26, %s1319_s26   ;;  %s969_s25 = sphi %s1057_s25, %s1318_s25   ;;  %s965_s24 = sphi %s1055_s24, %s1317_s24   ;;  %s961_s1 = sphi %s1053_s1, %s1316_s1  }
  0x23   : > { %s603_s9 = sadd.s32 4294967294, %s1001_s7   ;;  %s39_s10 = sadd.s32 1, %s993_s5 }
  0x24   : > { %s42_s11 = sadd.s32 1, %s997_s6  ;;  %p40_p10 = scmp.ge.s32.totalorder %s39_s10, 2 }
  0x25   : > { %s79_s12 = sadd.s32 1, %s981_s28  ;;  %p86_p11 = scmp.ne.s32.totalorder %s981_s28, %s977_s27 }
  0x26   : > { %p87_p12 = scmp.eq.s32.totalorder %s1001_s7, 0  ;;  %s1325_s10 = smov (%p40_p10, %s39_s10), 0 }
  0x27   : > { %1306 = sst [smem:[#allocation14_spill]] %s1325_s10  ;;  %s1327_s11 = smov (!%p40_p10, %s42_s11), %s997_s6 }
  0x28   : > { %s76_s13 = ssub.s32 %s993_s5, %s1325_s10  ;;  %p1119_p13 = por %p87_p12, %p86_p11 }
  0x29   : > { %p44_p0 = scmp.ge.s32.totalorder %s1327_s11, 2  ;;  %p77_p1 = scmp.eq.s32.totalorder %s76_s13, 0 }
  0x2a   : > { %p92_p2 = scmp.ne.s32.totalorder %s977_s27, %s973_s26  ;;  %p93_p3 = scmp.eq.s32.totalorder %s602_s8, 0 }
  0x2b   : > { %s1329_s11 = smov (%p44_p0, %s1327_s11), 0  ;;  %s105_s18 = sadd.s32 1, %s969_s25 }
  0x2c   : > { %1308 = sst [smem:[#allocation15_spill]] %s1329_s11  ;;  %p1129_p4 = por %p93_p3, %p92_p2 }
  0x2d   : > { %s1127_s15 = scalar_select %p77_p1, %s981_s28, %s79_s12  }
  0x2e   : > { %s102_s17 = ssub.s32 %s997_s6, %s1329_s11  ;;  %p115_p6 = scmp.ne.s32.totalorder %s969_s25, %s965_s24 }
  0x2f   : > { %p103_p5 = scmp.eq.s32.totalorder %s102_s17, 0  ;;  %p116_p7 = scmp.eq.s32.totalorder %s602_s8, 3 }
  0x30   : > { %p121_p9 = scmp.ne.s32.totalorder %s965_s24, %s961_s1  ;;  %p122_p10 = scmp.eq.s32.totalorder %s603_s9, 3 }
  0x31   : > { %s1139_s19 = scalar_select %p103_p5, %s969_s25, %s105_s18  }
  0x32   : > { %p1141_p8 = por %p116_p7, %p115_p6  ;;  %p698_p11 = scmp.lt.s32.totalorder %s1001_s7, 4 }
  0x33   : > { %s157_s21 = sand.u32 1, %s981_s28   ;;  %p1149_p12 = por %p122_p10, %p121_p9 }
  0x34   : > { %s606_s23 = sshll.u32 %s157_s21, 6  ;;  %s648_s0 = sshll.u32 %s993_s5, 10 }
  0x35   : > { %s167_s8 = scalar_lea.hbm %s1299_s3, %s648_s0  ;;  %s161_s13 = scalar_lea.vmem [#allocation6], %s606_s23 }
  0x36   : > { %s168_s17 = sshll.u32 %s161_s13, 4  ;;  %p1159_p0 = pnand %p698_p11, %p1119_p13  ;;  %s169_s17 = int_to_ptr.vmem [resolvable:$true] %s168_s17 }
  0x37   : > { %s158_s9 = scalar_lea.sflag [#allocation7], %s157_s21  ;;  %s864_s11 = scalar_lea.vmem %s169_s17, 1024 }
  0x38   : > { %p853_p1 = pneg %p1159_p0  ;;  %p865_p2 = scmp.ne.s32.totalorder %s169_s17, %s864_s11 }
  0x39   : > { %s1005_s10 = smov [#allocation6]  }
  0x3a   : > { %p867_p3 = pnand %p865_p2, %p853_p1  ;;  %s869_s6 = sshll.u32 %s1005_s10, 4  ;;  %s870_s6 = int_to_ptr.vmem [resolvable:$false] %s869_s6 }
  0x3b   : > { %s871_s0 = scalar_lea.vmem %s870_s6, 2048  ;;  %p872_p6 = scmp.lt.s32.totalorder %s169_s17, %s870_s6 }
  0x3c   : > { %p868_p5 = pneg %p867_p3  ;;  %p873_p7 = scmp.lt.s32.totalorder %s871_s0, %s864_s11 }
  0x3e   : > { %p874_p9 = por %p873_p7, %p872_p6 }
  0x40   : > { %p875_p13 = pnand %p874_p9, %p868_p5 }
  0x42   : > { %878 = shalt.err (!%p875_p13)
}
  0x43   : > { %s1006_s14 = smov 64   ;;  %s1007_s21 = smov 4  }
  0x44   : > { %693 = dma.hbm_to_vmem [thread:$0]  (!%p1159_p0), %s167_s8, 1024, %s169_s17, %s158_s9, %s1006_s14, %s1006_s14, %s1007_s21  }
  0x45   : > { %p609_p10 = scmp.ge.s32.totalorder %s1001_s7, 1  ;;  %p176_p11 = scmp.lt.s32.totalorder %s1001_s7, 5 }
  0x47   : > { %p177_p1 = pnand %p609_p10, %p176_p11 }
  0x48   : > { %s182_s10 = sand.u32 (!%p177_p1), 1, %s977_s27  }
  0x49   : > { %180 = sbr.rel (%p177_p1) target bundleno = 510 (0x1fe), region = 28  ;;  %s610_s23 = sshll.u32 (!%p177_p1), %s182_s10, 6 }
  0x4a   : > { %s183_s6 = scalar_lea.sflag (!%p177_p1), [#allocation7], %s182_s10  ;;  %s1170_s11 = scalar_lea.vmem (!%p177_p1), [#allocation6], %s610_s23 }
  0x4e   : > { %952 = dma.done.wait (%p1129_p4), %s183_s6, 1024  }
  0x4f   : > { %954 = vsyncadd (%p1129_p4), %s183_s6, 4294966272  ;;  %s214_s26 = sand.u32 1, %s965_s24   ;;  %s217_s12 = sld [smem:[#allocation4 + %s985_s29]] }
  0x50   : > { %s612_s8 = sshll.u32 %s989_s30, 1  ;;  %s1181_s13 = sshll.u32 %s214_s26, 3 }
  0x51   : > { %p221_p0 = scmp.lt.s32.totalorder %s612_s8, 3  ;;  %s216_s21 = scalar_lea.vmem [#allocation9], %s1181_s13 }
  0x52   : > { %p615_p4 = scmp.ne.s32.totalorder %s985_s29, 0 }
  0x53   : > { %s1331_s8 = smov (!%p221_p0, %s612_s8), 3 }
  0x55   : > { %p219_p2 = scmp.lt.s32.totalorder %s217_s12, 1 }
  0x57   : > { %s1333_s12 = smov (!%p219_p2, %s217_s12), 1  ;;  %235 = sbr.rel (%p615_p4) target bundleno = 94 (0x5e), region = 36 }
  0x58   : > { %s613_s17 = sshll.u32 %s1333_s12, 2 }
  0x59   : > { %s224_s18 = sadd.s32 %s613_s17, %s1331_s8 }
  0x5a   : > { %s614_s9 = sshll.u32 %s224_s18, 3 }
  0x5b   : > { %s226_s14 = scalar_lea.vmem %s1298_s2, %s614_s9 }
  0x5c   : > { %v1008_v0 = vmov 0.0  }
  0x5d   : > { %236 = vst [vmem:[#allocation2] sm:$0xff] %v1008_v0  ;;  %237 = vst [vmem:[#allocation2 + $0x8] sm:$0xff] %v1008_v0 }
  0x5e PF: > { %s240_s10 = sld [smem:[#allocation5 + %s985_s29]]  ;;  %v1009_v1 = vmov 0   ;;  %v239_v2 = vld [vmem:[%s226_s14 + $0x8] sm:$0xff]  ;;  %v238_v3 = vld [vmem:[%s226_s14] sm:$0xff]  ;;  %v1010_v4 = vmov 0.0   ;;  %v1011_v8 = vmov 1   ;;  %v244_v28 = vlaneseq }
  0x5f   : > { %807 = vset.pattern.permute.xlu1 %v1009_v1  ;;  %805 = vset.pattern.permute.xlu0 %v1009_v1  ;;  %v1012_v9 = vmov 2   ;;  %v819_v10 = vld [vmem:[%s1170_s11 + $0x38] sm:$0xff]   ;;  %v1013_v11 = vmov 3   ;;  %v1014_v12 = vmov 4   ;;  %v820_v13 = vld [vmem:[%s1170_s11 + $0x30] sm:$0xff]   ;;  %v1015_v14 = vmov 5  }
  0x60   : > { %666 = vmatprep.subr.bf16.mxu0 %v1010_v4  ;;  %v821_v15 = vld [vmem:[%s1170_s11 + $0x28] sm:$0xff]   ;;  %v1016_v16 = vmov 7   ;;  %v822_v17 = vld [vmem:[%s1170_s11 + $0x20] sm:$0xff]   ;;  %v823_v18 = vld [vmem:[%s1170_s11 + $0x18] sm:$0xff]   ;;  %v1017_v19 = vmov 6   ;;  %vm1018_vm0 = vmmov 0  }
  0x61   : > { %667 = vmatpush3.bf16.msra.mxu0 %v819_v10  ;;  %v824_v20 = vld [vmem:[%s1170_s11 + $0x10] sm:$0xff]   ;;  %v825_v21 = vld [vmem:[%s1170_s11 + $0x8] sm:$0xff]   ;;  %v826_v22 = vld [vmem:[%s1170_s11] sm:$0xff]   ;;  %682 = vmatprep.mubr.msk.bf16.mxu0 %vm1018_vm0, %v1010_v4  ;;  %v245_v31 = vand.u32 127, %v244_v28  ;;  %p640_p3 = scmp.ne.s32.totalorder %s985_s29, 1 }
  0x62   : > { %668 = vmatprep.subr.bf16.mxu0 %v1010_v4 }
  0x64   : > { %v241_v5 = vstv %s240_s10 }
  0x65   : > { %v243_v6 = vsub.s32 %v239_v2, %v241_v5  ;;  %v242_v7 = vsub.s32 %v238_v3, %v241_v5  ;;  %669 = vmatpush3.bf16.msra.mxu0 %v820_v13  ;;  %v359_v13 = vld [vmem:[#allocation2 + $0x8] sm:$0xff] }
  0x66   : > { %670 = vmatprep.subr.bf16.mxu0 %v1010_v4 }
  0x67   : > { %303 = vperm.xlu1 %807, %v243_v6   ;;  %247 = vperm.xlu0 %805, %v242_v7  }
  0x69   : > { %671 = vmatpush3.bf16.msra.mxu0 %v821_v15 }
  0x6a   : > { %672 = vmatprep.subr.bf16.mxu0 %v1010_v4 }
  0x6b   : > { %808 = vset.pattern.permute.xlu1 %v1011_v8  ;;  %806 = vset.pattern.permute.xlu0 %v1011_v8 }
  0x6c   : > { %310 = vperm.xlu1 %808, %v243_v6   ;;  %254 = vperm.xlu0 %806, %v242_v7  }
  0x6d   : > { %673 = vmatpush3.bf16.msra.mxu0 %v822_v17 }
  0x6e   : > { %674 = vmatprep.subr.bf16.mxu0 %v1010_v4 }
  0x70   : > { %809 = vset.pattern.permute.xlu1 %v1012_v9  ;;  %810 = vset.pattern.permute.xlu0 %v1012_v9  ;;  %v358_v9 = vld [vmem:[#allocation2] sm:$0xff] }
  0x71   : > { %261 = vperm.xlu1 %809, %v242_v7   ;;  %317 = vperm.xlu0 %810, %v243_v6  }
  0x72   : > { %675 = vmatpush3.bf16.msra.mxu0 %v823_v18 }
  0x73   : > { %676 = vmatprep.subr.bf16.mxu0 %v1010_v4 }
  0x75   : > { %811 = vset.pattern.permute.xlu1 %v1013_v11  ;;  %812 = vset.pattern.permute.xlu0 %v1014_v12 }
  0x76   : > { %268 = vperm.xlu1 %811, %v242_v7   ;;  %275 = vperm.xlu0 %812, %v242_v7  }
  0x77   : > { %677 = vmatpush3.bf16.msra.mxu0 %v824_v20 }
  0x78   : > { %678 = vmatprep.subr.bf16.mxu0 %v1010_v4 }
  0x7a   : > { %324 = vperm.xlu1 %811, %v243_v6   ;;  %815 = vset.pattern.permute.xlu0 %v1015_v14 }
  0x7b   : > { %338 = vperm.xlu0 %815, %v243_v6   ;;  %679 = vmatpush3.bf16.msra.mxu0 %v825_v21 }
  0x7c   : > { %680 = vmatprep.subr.bf16.mxu0 %v1010_v4 }
  0x7e   : > { %813 = vset.pattern.permute.xlu1 %v1014_v12 }
  0x7f   : > { %331 = vperm.xlu1 %813, %v243_v6   ;;  %817 = vset.pattern.permute.xlu0 %v1016_v16 }
  0x80   : > { %296 = vperm.xlu0 %817, %v242_v7   ;;  %681 = vmatpush3.bf16.msra.mxu0 %v826_v22 }
  0x83   : > { %814 = vset.pattern.permute.xlu1 %v1015_v14 }
  0x84   : > { %282 = vperm.xlu1 %814, %v242_v7  }
  0x88   : > { %816 = vset.pattern.permute.xlu1 %v1017_v19 }
  0x89   : > { %289 = vperm.xlu1 %816, %v242_v7  }
  0x8d   : > { %345 = vperm.xlu1 %816, %v243_v6  }
  0x91   : > { %818 = vset.pattern.permute.xlu1 %v1016_v16 }
  0x92   : > { %352 = vperm.xlu1 %818, %v243_v6  }
  0xe2   : > { %v304_v23 = vpop.permute.xlu1 %303  ;;  %v248_v26 = vpop.permute.xlu0 %247 }
  0xe3   : > { %vm249_vm1 = vcmp.eq.s32.totalorder %v248_v26, %v245_v31  ;;  %vm305_vm5 = vcmp.eq.s32.totalorder %v304_v23, %v245_v31 }
  0xe4   : > { %v616_v33 = vsel %vm249_vm1, 1.0, %v1010_v4  ;;  %v624_v41 = vsel %vm305_vm5, 1.0, %v1010_v4 }
  0xe7   : > { %v311_v24 = vpop.permute.xlu1 %310  ;;  %v255_v29 = vpop.permute.xlu0 %254 }
  0xe8   : > { %vm256_vm2 = vcmp.eq.s32.totalorder %v255_v29, %v245_v31  ;;  %vm312_vm3 = vcmp.eq.s32.totalorder %v311_v24, %v245_v31 }
  0xe9   : > { %v617_v34 = vsel %vm256_vm2, 1.0, %v1010_v4  ;;  %v625_v37 = vsel %vm312_vm3, 1.0, %v1010_v4 }
  0xea   : > { %v259_v36 = vadd.f32 %v617_v34, %v616_v33  ;;  %v315_v44 = vadd.f32 %v625_v37, %v624_v41 }
  0xec   : > { %v262_v25 = vpop.permute.xlu1 %261  ;;  %v318_v35 = vpop.permute.xlu0 %317 }
  0xed   : > { %vm263_vm4 = vcmp.eq.s32.totalorder %v262_v25, %v245_v31  ;;  %vm319_vm6 = vcmp.eq.s32.totalorder %v318_v35, %v245_v31 }
  0xee   : > { %v618_v38 = vsel %vm263_vm4, 1.0, %v1010_v4  ;;  %v626_v42 = vsel %vm319_vm6, 1.0, %v1010_v4 }
  0xef   : > { %v266_v45 = vadd.f32 %v618_v38, %v259_v36  ;;  %v322_v48 = vadd.f32 %v626_v42, %v315_v44 }
  0xf1   : > { %v269_v27 = vpop.permute.xlu1 %268  ;;  %v276_v39 = vpop.permute.xlu0 %275 }
  0xf2   : > { %vm270_vm7 = vcmp.eq.s32.totalorder %v269_v27, %v245_v31  ;;  %vm277_vm9 = vcmp.eq.s32.totalorder %v276_v39, %v245_v31 }
  0xf3   : > { %v619_v43 = vsel %vm270_vm7, 1.0, %v1010_v4  ;;  %v620_v51 = vsel %vm277_vm9, 1.0, %v1010_v4 }
  0xf4   : > { %v273_v49 = vadd.f32 %v619_v43, %v266_v45 }
  0xf5   : > { %v325_v30 = vpop.permute.xlu1 %324 }
  0xf6   : > { %vm326_vm8 = vcmp.eq.s32.totalorder %v325_v30, %v245_v31  ;;  %v339_v47 = vpop.permute.xlu0 %338  ;;  %v280_v56 = vadd.f32 %v620_v51, %v273_v49 }
  0xf7   : > { %v627_v46 = vsel %vm326_vm8, 1.0, %v1010_v4  ;;  %vm340_vm12 = vcmp.eq.s32.totalorder %v339_v47, %v245_v31 }
  0xf8   : > { %v329_v53 = vadd.f32 %v627_v46, %v322_v48  ;;  %v629_v59 = vsel %vm340_vm12, 1.0, %v1010_v4 }
  0xfa   : > { %v332_v32 = vpop.permute.xlu1 %331 }
  0xfb   : > { %vm333_vm10 = vcmp.eq.s32.totalorder %v332_v32, %v245_v31  ;;  %v297_v55 = vpop.permute.xlu0 %296 }
  0xfc   : > { %v628_v52 = vsel %vm333_vm10, 1.0, %v1010_v4  ;;  %vm298_vm15 = vcmp.eq.s32.totalorder %v297_v55, %v245_v31 }
  0xfd   : > { %v336_v57 = vadd.f32 %v628_v52, %v329_v53  ;;  %v623_v1 = vsel %vm298_vm15, 1.0, %v1010_v4 }
  0xff   : > { %v283_v40 = vpop.permute.xlu1 %282  ;;  %v343_v63 = vadd.f32 %v629_v59, %v336_v57 }
 0x100   : > { %vm284_vm11 = vcmp.eq.s32.totalorder %v283_v40, %v245_v31 }
 0x101   : > { %v621_v54 = vsel %vm284_vm11, 1.0, %v1010_v4 }
 0x102   : > { %v287_v61 = vadd.f32 %v621_v54, %v280_v56 }
 0x104   : > { %v290_v50 = vpop.permute.xlu1 %289 }
 0x105   : > { %vm291_vm13 = vcmp.eq.s32.totalorder %v290_v50, %v245_v31 }
 0x106   : > { %v622_v60 = vsel %vm291_vm13, 1.0, %v1010_v4 }
 0x107   : > { %v294_v0 = vadd.f32 %v622_v60, %v287_v61 }
 0x108   : > { %v346_v58 = vpop.permute.xlu1 %345 }
 0x109   : > { %vm347_vm14 = vcmp.eq.s32.totalorder %v346_v58, %v245_v31  ;;  %v301_v6 = vadd.f32 %v623_v1, %v294_v0 }
 0x10a   : > { %v630_v62 = vsel %vm347_vm14, 1.0, %v1010_v4 }
 0x10b   : > { %v350_v3 = vadd.f32 %v630_v62, %v343_v63 }
 0x10d   : > { %v353_v2 = vpop.permute.xlu1 %352 }
 0x10e   : > { %vm354_vm0 = vcmp.eq.s32.totalorder %v353_v2, %v245_v31 }
 0x10f   : > { %v631_v5 = vsel %vm354_vm0, 1.0, %v1010_v4 }
 0x110   : > { %v357_v7 = vadd.f32 %v631_v5, %v350_v3 }
 0x112   : > { %v360_v8 = vpack.c.bf16 %v357_v7, %v301_v6 }
 0x114   : > { %683 = vmatmul.mubr.bf16.vlgmr.msra.gmra.mxu0 %v360_v8 }
 0x1d4   : > { %v459_v10 = vpop.f32.mrf.mxu0 }
 0x1d5   : > { %v466_v11 = vadd.f32 %v459_v10, %v358_v9 }
 0x1d6   : > { %v684_v12 = vpop.f32.mrf.mxu0 }
 0x1d7   : > { %468 = vst [vmem:[#allocation2] sm:$0xff] %v466_v11  ;;  %473 = sbr.rel (%p640_p3) target bundleno = 486 (0x1e6), region = 40 }
 0x1d8   : > { %v462_v14 = vpop.f32.mrf.mxu0 }
 0x1d9   : > { %v467_v15 = vadd.f32 %v462_v14, %v359_v13 }
 0x1da   : > { %v685_v16 = vpop.f32.mrf.mxu0 }
 0x1db   : > { %469 = vst [vmem:[#allocation2 + $0x8] sm:$0xff] %v467_v15 }
 0x1de   : > { %v474_v17 = vld [vmem:[#allocation2] sm:$0xff] }
 0x1e2   : > { %v475_v4 = vld [vmem:[#allocation2 + $0x8] sm:$0xff] }
 0x1e3   : > { %v655_v18 = vpack.c.bf16 %v475_v4, %v474_v17 }
 0x1e5   : > { %656 = vst [vmem:[%s216_s21] sm:$0xff] %v655_v18  }
 0x1e6 PF: > { %s651_s23 = sshll.u32 %s989_s30, 7  ;;  %s500_s29 = sshll.u32 %s216_s21, 4  ;;  %s1233_s29 = int_to_ptr.vmem [resolvable:$true] %s500_s29 }
 0x1e7   : > { %s1229_s12 = scalar_lea.hbm %s1300_s4, %s651_s23  ;;  %s1237_s8 = scalar_lea.sflag [#allocation8], %s214_s26 }
 0x1e8   : > { %s879_s17 = scalar_lea.vmem %s1233_s29, 128  ;;  %s1019_s30 = smov [#allocation9]  }
 0x1e9   : > { %p880_p5 = scmp.ne.s32.totalorder %s1233_s29, %s879_s17  ;;  %s883_s18 = sshll.u32 %s1019_s30, 4  ;;  %s884_s18 = int_to_ptr.vmem [resolvable:$false] %s883_s18 }
 0x1ea   : > { %s885_s9 = scalar_lea.vmem %s884_s18, 256  ;;  %p886_p9 = scmp.lt.s32.totalorder %s1233_s29, %s884_s18 }
 0x1eb   : > { %p881_p6 = pnand %p880_p5, %p1141_p8  ;;  %p887_p13 = scmp.lt.s32.totalorder %s885_s9, %s879_s17 }
 0x1ed   : > { %p882_p7 = pneg %p881_p6  ;;  %p888_p10 = por %p887_p13, %p886_p9 }
 0x1ef   : > { %p889_p11 = pnand %p888_p10, %p882_p7 }
 0x1f1   : > { %892 = shalt.err (!%p889_p11)
}
 0x1f2   : > { %s893_s26 = scalar_lea.hbm %s1229_s12, 128  ;;  %s897_s0 = scalar_lea.hbm %s1300_s4, 256 }
 0x1f3   : > { %p894_p1 = scmp.ne.s32.totalorder %s1229_s12, %s893_s26  ;;  %p898_p4 = scmp.lt.s32.totalorder %s1229_s12, %s1300_s4 }
 0x1f4   : > { %p899_p3 = scmp.lt.s32.totalorder %s897_s0, %s893_s26 }
 0x1f5   : > { %p895_p0 = pnand %p894_p1, %p1141_p8 }
 0x1f6   : > { %p900_p5 = por %p899_p3, %p898_p4 }
 0x1f7   : > { %p896_p2 = pneg %p895_p0 }
 0x1f9   : > { %p901_p6 = pnand %p900_p5, %p896_p2 }
 0x1fb   : > { %904 = shalt.err (!%p901_p6)
}
 0x1fc   : > { %s1020_s10 = smov 64   ;;  %s1021_s23 = smov 4  }
 0x1fd   : > { %688 = dma.vmem_to_hbm [thread:$0]  (%p1141_p8), %s1233_s29, 128, %s1229_s12, %s1237_s8, %s1020_s10, %s1020_s10, %s1021_s23  }
 0x1fe PF: > { %p699_p7 = scmp.ge.s32.totalorder %s1001_s7, 2  ;;  %s515_s6 = sand.u32 1, %s961_s1  }
 0x1ff   : > { %s516_s11 = scalar_lea.sflag [#allocation8], %s515_s6 }
 0x200   : > { %p695_p9 = pnand %p699_p7, %p1149_p12 }
 0x202   : > { %p696_p13 = pneg %p695_p9 }
 0x204   : > { %956 = dma.done.wait (%p696_p13), %s516_s11, 128  }
 0x205   : > { %958 = vsyncadd (%p696_p13), %s516_s11, 4294967168  ;;  %s30_s7 = sadd.s32 1, %s1001_s7   ;;  %s1313_s30 = sld [smem:[#allocation13_spill]] }
 0x206   : > { %p27_p10 = scmp.ge.s32.totalorder %s30_s7, 6   ;;  %s1314_s20 = sld [smem:[#allocation14_spill]] }
 0x207   : > { %s1315_s6 = sld [smem:[#allocation15_spill]]  ;;  %s1316_s1 = smov %s965_s24 }
 0x208   : > { %s1317_s24 = smov %s969_s25  ;;  %s1318_s25 = smov %s1139_s19 }
 0x209   : > { %s1319_s26 = smov %s977_s27  ;;  %s1320_s27 = smov %s981_s28 }
 0x20a   : > { %s1321_s28 = smov %s1127_s15  ;;  %s1322_s29 = smov %s993_s5 }
 0x20b   :  { %29 = sbr.rel (!%p27_p10) target bundleno = 34 (0x22), region = 84 }
 0x20c   : > { %s1323_s5 = smov %s1314_s20 }
 0x210   :  { %521 = vsyncpa [#allocation7], 1 }
 0x211   :  { %523 = vsyncpa [#allocation7 + $0x1], 1 }
 0x212   :  { %524 = vsyncpa [#allocation8], 1 }
 0x213   :  { %526 = vsyncpa [#allocation8 + $0x1], 1 }

</bundles_post_ra>
